<compile_context>
chip_gen: v7x
topology: tpu7x:2x2x1
jax: 0.10.0
libtpu: 0.0.40
codegen_flags: <defaults>
</compile_context>

<pallas_src>
import jax
import jax.numpy as jnp
from jax.experimental import pallas as pl
from jax.experimental.pallas import tpu as pltpu

_TILE_BYTES = 4 * 1024 * 1024            # ~4 MiB per grid step, dtype-agnostic
_LANE_CANDIDATES = (2048, 1024, 512, 256, 128)
_VMEM_LIMIT = 32 * 1024 * 1024           # raises v5e's 16 MiB default; default on v6e/v7x


def _event_filter_kernel(thr_ref, x_ref, o_ref):
    # thr_ref: (1, 1) f32 in SMEM.  x_ref / o_ref: (tile_rows, lanes) VMEM tiles.
    thr = thr_ref[0, 0].astype(x_ref.dtype)
    v = x_ref[...] - thr
    one = jnp.ones_like(v)
    zero = jnp.zeros_like(v)
    # (sign(v) + 1) / 2 without jnp.sign:
    #   v > 0 -> 1, v < 0 -> 0, v == 0 -> (0 + 1) * 0.5 = 0.5, NaN -> NaN.
    o_ref[...] = jnp.where(v > 0, one, jnp.where(v < 0, zero, (v + one) * 0.5))


def event_filter(x, threshold):
    """x: float array of any shape (e.g. NCHW). threshold: python/0-d float (may be traced)."""
    orig_shape = x.shape

    # torch's `(sign + 1) / 2` true-division yields floats; promote non-floats only.
    if not jnp.issubdtype(x.dtype, jnp.floating):
        x = x.astype(jnp.float32)
    dtype = x.dtype
    itemsize = jnp.dtype(dtype).itemsize

    # Runtime scalar -> SMEM operand (jit-safe, no per-value recompile).
    thr = jnp.asarray(threshold, dtype=jnp.float32).reshape(1, 1)

    n = x.size
    # Widest lane count (multiple of 128) that divides numel -> free reshape, no pad.
    lanes = None
    for cand in _LANE_CANDIDATES:
        if n % cand == 0:
            lanes = cand
            break

    padded_len = None
    if lanes is None:
        # Rare fallback: numel not divisible by 128.  Pad only to the next 128
        # boundary (one extra copy in / out; unavoidable without a tail kernel).
        # TODO(synk): handle the <128-element tail with a masked final block to
        # avoid the pad/slice copies for unaligned shapes.
        lanes = 128
        rows = pl.cdiv(n, lanes)
        padded_len = rows * lanes
        flat = jnp.pad(x.reshape(-1), (0, padded_len - n))
    else:
        rows = n // lanes
        flat = x.reshape(-1)
    slab = flat.reshape(rows, lanes)

    # Tile rows sized for ~_TILE_BYTES per step regardless of dtype, multiple of 8.
    max_tile_rows = max(8, (_TILE_BYTES // (lanes * itemsize)) // 8 * 8)
    tile_rows = min(max_tile_rows, rows)

    # If the whole slab would be a single block but it is big enough to matter,
    # split it in two so v7x's two TensorCores both get work ("parallel" axis).
    slab_bytes = rows * lanes * itemsize
    if tile_rows >= rows and rows >= 16 and slab_bytes >= (1 << 20):
        tile_rows = max(8, ((rows + 1) // 2 + 7) // 8 * 8)
    if tile_rows >= rows:
        tile_rows = rows  # full-extent block (valid even when rows % 8 != 0)

    grid = (pl.cdiv(rows, tile_rows),)

    out_slab = pl.pallas_call(
        _event_filter_kernel,
        out_shape=jax.ShapeDtypeStruct(slab.shape, dtype),
        grid=grid,
        in_specs=[
            pl.BlockSpec(memory_space=pltpu.MemorySpace.SMEM),      # threshold (1,1) f32
            pl.BlockSpec((tile_rows, lanes), lambda i: (i, 0)),     # input tile
        ],
        out_specs=pl.BlockSpec((tile_rows, lanes), lambda i: (i, 0)),
        compiler_params=pltpu.CompilerParams(
            dimension_semantics=("parallel",),
            vmem_limit_bytes=_VMEM_LIMIT,
        ),
    )(thr, slab)

    if padded_len is not None:
        out = out_slab.reshape(-1)[:n].reshape(orig_shape)
    else:
        out = out_slab.reshape(orig_shape)
    return out


if __name__ == "__main__":
    key = jax.random.PRNGKey(0)
    k_thr, k_x = jax.random.split(key)

    # Deterministic "parameter" init, mirroring random_uniform(0, 1) in __init__.
    # Passed as a traced-friendly JAX scalar (no Python float conversion needed).
    threshold = jax.random.uniform(k_thr, (), minval=0.0, maxval=1.0)

    # Small NCHW input consistent with a conv-style module.
    x = jax.random.normal(k_x, (2, 4, 16, 16), dtype=jnp.float32)

    out = event_filter(x, threshold)
    out = jax.block_until_ready(out)

    # Sanity check against pure-JAX reference of the torch forward.
    ref = (jnp.sign(x - threshold) + 1.0) / 2.0
    assert out.shape == x.shape
    assert out.dtype == x.dtype
    assert jnp.allclose(out, ref), "mismatch vs reference"

    print("KERNEL_OK")
</pallas_src>

<mosaic_0001>
module attributes {stable_mosaic.version = 11 : i64} {
  func.func @_event_filter_kernel(%arg0: i32, %arg1: memref<1x1xf32, #tpu.memory_space<smem>>, %arg2: memref<1x2048xf32, #tpu.memory_space<vmem>>, %arg3: memref<1x2048xf32, #tpu.memory_space<vmem>>) attributes {dimension_semantics = [#tpu.dimension_semantics<parallel>], iteration_bounds = array<i64: 1>, scalar_prefetch = 0 : i64, scratch_operands = 0 : i64, tpu.core_type = #tpu.core_type<tc>, window_params = [{transform_indices = @transform_0, window_bounds = array<i64: 1, 1>}, {transform_indices = @transform_1, window_bounds = array<i64: 1, 2048>}, {transform_indices = @transform_2, window_bounds = array<i64: 1, 2048>}]} {
    %c0 = arith.constant 0 : index
    %c0_0 = arith.constant 0 : index
    %0 = memref.load %arg1[%c0, %c0_0] : memref<1x1xf32, #tpu.memory_space<smem>>
    %c0_1 = arith.constant 0 : index
    %c0_2 = arith.constant 0 : index
    %1 = vector.load %arg2[%c0_1, %c0_2] : memref<1x2048xf32, #tpu.memory_space<vmem>>, vector<1x2048xf32>
    %2 = vector.broadcast %0 : f32 to vector<1x2048xf32>
    %3 = arith.subf %1, %2 : vector<1x2048xf32>
    %cst = arith.constant 1.000000e+00 : f32
    %4 = vector.broadcast %cst : f32 to vector<1x2048xf32>
    %cst_3 = arith.constant 0.000000e+00 : f32
    %5 = vector.broadcast %cst_3 : f32 to vector<1x2048xf32>
    %cst_4 = arith.constant 0.000000e+00 : f32
    %6 = vector.broadcast %cst_4 : f32 to vector<1x2048xf32>
    %7 = arith.cmpf ogt, %3, %6 : vector<1x2048xf32>
    %cst_5 = arith.constant 0.000000e+00 : f32
    %8 = vector.broadcast %cst_5 : f32 to vector<1x2048xf32>
    %9 = arith.cmpf olt, %3, %8 : vector<1x2048xf32>
    %10 = arith.addf %3, %4 : vector<1x2048xf32>
    %cst_6 = arith.constant 5.000000e-01 : f32
    %11 = vector.broadcast %cst_6 : f32 to vector<1x2048xf32>
    %12 = arith.mulf %10, %11 : vector<1x2048xf32>
    %13 = arith.select %9, %5, %12 : vector<1x2048xi1>, vector<1x2048xf32>
    %14 = arith.select %7, %4, %13 : vector<1x2048xi1>, vector<1x2048xf32>
    %c0_7 = arith.constant 0 : index
    %c0_8 = arith.constant 0 : index
    %15 = vector.load %arg3[%c0_7, %c0_8] : memref<1x2048xf32, #tpu.memory_space<vmem>>, vector<1x2048xf32>
    tpu.vector_store %arg3[%c0_7, %c0_8], %14 {strides = array<i32>} : memref<1x2048xf32, #tpu.memory_space<vmem>>, vector<1x2048xf32>,
    return
  }
  func.func @transform_0(%arg0: i32) -> (i32, i32) {
    %c0_i32 = arith.constant 0 : i32
    %c0_i32_0 = arith.constant 0 : i32
    %c0_i32_1 = arith.constant 0 : i32
    return %c0_i32, %c0_i32_0 : i32, i32
  }
  func.func @transform_1(%arg0: i32) -> (i32, i32) {
    %c0_i32 = arith.constant 0 : i32
    %c0_i32_0 = arith.constant 0 : i32
    return %arg0, %c0_i32 : i32, i32
  }
  func.func @transform_2(%arg0: i32) -> (i32, i32) {
    %c0_i32 = arith.constant 0 : i32
    %c0_i32_0 = arith.constant 0 : i32
    return %arg0, %c0_i32 : i32, i32
  }
}

</mosaic_0001>

<bundles_post_ra>
// kernel: tpu_custom_call.1
= control target key start
LH: loop header
LB: loop body
LE: loop exit
PB: predicated region body
PF: predicated region fallthrough
CT: control target
= control target key end

     0   :  { %8 = vsyncpa [#allocation4], 0  ;;  %s154_s0 = inlined_call_operand.<no memory space> [shape: f32[1,1], index: 0, kind: input, shape index: {}]   ;;  %s155_s1 = inlined_call_operand.hbm [shape: f32[1,2048], index: 1, kind: input, shape index: {}]   ;;  %s156_s2 = inlined_call_operand.hbm [shape: f32[1,2048], index: 2, kind: output, shape index: {}]  }
   0x1   :  { %9 = vsyncpa [#allocation5], 0  ;;  %s110_s9 = smov [#allocation3]   ;;  %s62_s13 = scalar_lea.hbm %s155_s1, 256 }
   0x2   :  { %s18_s10 = sshll.u32 %s110_s9, 4  ;;  %p63_p0 = scmp.ne.s32.totalorder %s155_s1, %s62_s13  ;;  %s19_s10 = int_to_ptr.vmem [resolvable:$true] %s18_s10 }
   0x3   :  { %p66_p1 = scmp.lt.u32.totalorder %s62_s13, %s155_s1 }
   0x5   :  { %p68_p2 = pnand %p66_p1, %p63_p0 }
   0x7   :  { %71 = shalt.err (!%p68_p2)
}
   0x8   :  { %s72_s18 = scalar_lea.vmem %s19_s10, 256  ;;  %p77_p4 = scmp.lt.s32.totalorder %s19_s10, %s19_s10 }
   0x9   :  { %p73_p3 = scmp.ne.s32.totalorder %s19_s10, %s72_s18  ;;  %p78_p5 = scmp.lt.s32.totalorder %s72_s18, %s72_s18 }
   0xb   :  { %p79_p6 = por %p78_p5, %p77_p4 }
   0xd   :  { %p80_p7 = pnand %p79_p6, %p73_p3 }
   0xf   :  { %83 = shalt.err (!%p80_p7)
}
  0x10   :  { %21 = dma.hbm_to_vmem [thread:$0]  %s155_s1, 256, %s19_s10, [#allocation4]  }
  0x11   :  { %106 = dma.done.wait [#allocation4], 256  }
  0x12   :  { %107 = vsyncadd [#allocation4], 4294967040  ;;  %v28_v0 = vstv %s154_s0  ;;  %v26_v1 = vld [vmem:[#allocation3] sm:$0xff]  ;;  %v27_v2 = vld [vmem:[#allocation3 + $0x8] sm:$0xff]  ;;  %s111_s23 = smov [#allocation6]  }
  0x13   :  { %v29_v3 = vsub.f32 %v26_v1, %v28_v0  ;;  %v30_v4 = vsub.f32 %v27_v2, %v28_v0  ;;  %s51_s24 = sshll.u32 %s111_s23, 4  ;;  %s52_s24 = int_to_ptr.vmem [resolvable:$true] %s51_s24 }
  0x14   :  { %s84_s0 = scalar_lea.vmem %s52_s24, 256  ;;  %p89_p9 = scmp.lt.s32.totalorder %s52_s24, %s52_s24 }
  0x15   :  { %v35_v5 = vadd.f32 1.0, %v29_v3  ;;  %vm33_vm0 = vcmp.lt.f32.partialorder %v29_v3, 0.0  ;;  %v36_v6 = vadd.f32 1.0, %v30_v4  ;;  %vm31_vm1 = vcmp.gt.f32.partialorder %v29_v3, 0.0  ;;  %p85_p8 = scmp.ne.s32.totalorder %s52_s24, %s84_s0  ;;  %p90_p10 = scmp.lt.s32.totalorder %s84_s0, %s84_s0 }
  0x16   :  { %vm34_vm2 = vcmp.lt.f32.partialorder %v30_v4, 0.0  ;;  %vm32_vm3 = vcmp.gt.f32.partialorder %v30_v4, 0.0 }
  0x17   :  { %v37_v7 = vmul.f32 0.5, %v35_v5  ;;  %v38_v8 = vmul.f32 0.5, %v36_v6  ;;  %p91_p11 = por %p90_p10, %p89_p9 }
  0x19   :  { %v39_v9 = vsel %vm33_vm0, 0.0, %v37_v7  ;;  %v40_v11 = vsel %vm34_vm2, 0.0, %v38_v8  ;;  %p92_p12 = pnand %p91_p11, %p85_p8 }
  0x1a   :  { %v41_v10 = vsel %vm31_vm1, 1.0, %v39_v9  ;;  %v42_v12 = vsel %vm32_vm3, 1.0, %v40_v11 }
  0x1b   :  { %43 = vst [vmem:[#allocation6] sm:$0xff] %v41_v10  ;;  %44 = vst [vmem:[#allocation6 + $0x8] sm:$0xff] %v42_v12 }
  0x1c   :  { %95 = shalt.err (!%p92_p12)
}
  0x1d   :  { %s96_s26 = scalar_lea.hbm %s156_s2, 256 }
  0x1e   :  { %p97_p13 = scmp.ne.s32.totalorder %s156_s2, %s96_s26  ;;  %p100_p0 = scmp.lt.u32.totalorder %s96_s26, %s156_s2 }
  0x20   :  { %p102_p1 = pnand %p100_p0, %p97_p13 }
  0x22   :  { %105 = shalt.err (!%p102_p1)
}
  0x23   :  { %54 = dma.vmem_to_hbm [thread:$0]  %s52_s24, 256, %s156_s2, [#allocation5]  }
  0x24   :  { %108 = dma.done.wait [#allocation5], 256  }
  0x25   :  { %109 = vsyncadd [#allocation5], 4294967040 }
  0x26   :  { %58 = vsyncpa [#allocation4], 1 }
  0x27   :  { %59 = vsyncpa [#allocation5], 1 }

</bundles_post_ra>
